<compile_context>
chip_gen: v5e
topology: v5e:2x2
jax: 0.10.0
libtpu: 0.0.40
codegen_flags: <defaults>
</compile_context>

<pallas_src>
import functools

import jax
import jax.numpy as jnp
from jax.experimental import pallas as pl
from jax.experimental.pallas import tpu as pltpu

IN_DIM = 3
HID_DIM = 64
OUT_DIM = 28 * 28  # 784


def decoder_kernel(x_ref, w1_ref, b1_ref, w2_ref, b2_ref, o_ref):
    # ---- Layer 1: (TB,3) @ (3,64) + b1, ReLU -------------------------------
    # K=3 would be an almost-empty MXU pass, so do it on the VPU as 3 broadcast
    # FMAs in fp32 (negligible FLOPs, keeps full precision).
    x = x_ref[...]                                   # (TB, 3)   f32
    w1 = w1_ref[...]                                 # (3, 64)   f32
    h = b1_ref[...]                                  # (1, 64) -> broadcasts
    for k in range(IN_DIM):                          # static unroll (IN_DIM = 3)
        h = h + x[:, k:k + 1] * w1[k:k + 1, :]
    h = jnp.maximum(h, 0.0)                          # (TB, 64)  f32

    # ---- Layer 2: (TB,64) @ (64,784) + b2 ----------------------------------
    # f32 operands on the MXU with fp32 accumulation; kernel is writeback-bound,
    # so there's no benefit to narrowing the matmul inputs on v6e/v7x.
    out = jnp.dot(h, w2_ref[...], preferred_element_type=jnp.float32)
    out = out + b2_ref[...]
    o_ref[...] = out.astype(o_ref.dtype)             # (TB, 784) store


@functools.partial(jax.jit, static_argnames=("tb",))
def decoder_forward(x, w1, b1, w2, b2, *, tb=512):
    """x:(B,3) f32, w1:(3,64) f32, b1:(1,64) f32, w2:(64,784) f32, b2:(1,784) f32."""
    B = x.shape[0]

    # Batch tile: sublane-aligned (multiple of 8), never larger than padded batch.
    TB = min(tb, max(8, pl.cdiv(B, 8) * 8))
    Bp = pl.cdiv(B, TB) * TB
    xp = x if Bp == B else jnp.pad(x, ((0, Bp - B), (0, 0)))

    out = pl.pallas_call(
        decoder_kernel,
        out_shape=jax.ShapeDtypeStruct((Bp, OUT_DIM), x.dtype),
        grid=(Bp // TB,),
        in_specs=[
            pl.BlockSpec((TB, IN_DIM), lambda i: (i, 0)),        # x: pipelined per tile
            pl.BlockSpec((IN_DIM, HID_DIM), lambda i: (0, 0)),   # weights: constant index_map
            pl.BlockSpec((1, HID_DIM), lambda i: (0, 0)),        #   -> fetched once,
            pl.BlockSpec((HID_DIM, OUT_DIM), lambda i: (0, 0)),  #   VMEM-resident across steps
            pl.BlockSpec((1, OUT_DIM), lambda i: (0, 0)),
        ],
        out_specs=pl.BlockSpec((TB, OUT_DIM), lambda i: (i, 0)),
        compiler_params=pltpu.CompilerParams(
            dimension_semantics=("parallel",)),                  # megacore batch sharding (v7x)
    )(xp, w1, b1, w2, b2)

    # Only a row-slice remains, and only when B needed padding to a tile multiple.
    return out if Bp == B else out[:B]


def init_params(key):
    # Deterministic init mimicking PyTorch nn.Linear default:
    # U(-1/sqrt(fan_in), 1/sqrt(fan_in)) for both weight and bias.
    k1, k2, k3, k4 = jax.random.split(key, 4)

    bound1 = 1.0 / jnp.sqrt(IN_DIM)
    w1 = jax.random.uniform(k1, (IN_DIM, HID_DIM), jnp.float32, -bound1, bound1)
    b1 = jax.random.uniform(k2, (1, HID_DIM), jnp.float32, -bound1, bound1)

    bound2 = 1.0 / jnp.sqrt(HID_DIM)
    w2 = jax.random.uniform(k3, (HID_DIM, OUT_DIM), jnp.float32, -bound2, bound2)
    b2 = jax.random.uniform(k4, (1, OUT_DIM), jnp.float32, -bound2, bound2)
    return w1, b1, w2, b2


def _reference(x, w1, b1, w2, b2):
    h = jnp.maximum(
        jnp.dot(x, w1, precision=jax.lax.Precision.HIGHEST) + b1, 0.0)
    return jnp.dot(h, w2, precision=jax.lax.Precision.HIGHEST) + b2


if __name__ == "__main__":
    key = jax.random.PRNGKey(0)
    pkey, xkey1, xkey2 = jax.random.split(key, 3)
    w1, b1, w2, b2 = init_params(pkey)

    # Small sanity case (single grid step, no padding / no slice).
    B = 8
    x = jax.random.normal(xkey1, (B, IN_DIM), jnp.float32)
    out = jax.block_until_ready(decoder_forward(x, w1, b1, w2, b2))
    ref = _reference(x, w1, b1, w2, b2)
    assert out.shape == (B, OUT_DIM)
    assert jnp.allclose(out, ref, atol=1e-2, rtol=1e-2)

    # Multi-tile case: exercises the batch grid + padding/row-slice path.
    B2 = 200
    x2 = jax.random.normal(xkey2, (B2, IN_DIM), jnp.float32)
    out2 = jax.block_until_ready(decoder_forward(x2, w1, b1, w2, b2, tb=64))
    ref2 = _reference(x2, w1, b1, w2, b2)
    assert out2.shape == (B2, OUT_DIM)
    assert jnp.allclose(out2, ref2, atol=1e-2, rtol=1e-2)

    print("KERNEL_OK")
</pallas_src>

<mosaic_0001>
module attributes {stable_mosaic.version = 11 : i64} {
  func.func @decoder_kernel(%arg0: i32, %arg1: memref<8x3xf32, #tpu.memory_space<vmem>>, %arg2: memref<3x64xf32, #tpu.memory_space<vmem>>, %arg3: memref<1x64xf32, #tpu.memory_space<vmem>>, %arg4: memref<64x784xf32, #tpu.memory_space<vmem>>, %arg5: memref<1x784xf32, #tpu.memory_space<vmem>>, %arg6: memref<8x784xf32, #tpu.memory_space<vmem>>) attributes {dimension_semantics = [#tpu.dimension_semantics<parallel>], iteration_bounds = array<i64: 1>, scalar_prefetch = 0 : i64, scratch_operands = 0 : i64, tpu.core_type = #tpu.core_type<tc>, window_params = [{transform_indices = @transform_0, window_bounds = array<i64: 8, 3>}, {pipeline_mode = #tpu.pipeline_mode<synchronous>, transform_indices = @transform_1, window_bounds = array<i64: 3, 64>}, {pipeline_mode = #tpu.pipeline_mode<synchronous>, transform_indices = @transform_2, window_bounds = array<i64: 1, 64>}, {pipeline_mode = #tpu.pipeline_mode<synchronous>, transform_indices = @transform_3, window_bounds = array<i64: 64, 784>}, {pipeline_mode = #tpu.pipeline_mode<synchronous>, transform_indices = @transform_4, window_bounds = array<i64: 1, 784>}, {transform_indices = @transform_5, window_bounds = array<i64: 8, 784>}]} {
    %c0 = arith.constant 0 : index
    %c0_0 = arith.constant 0 : index
    %0 = vector.load %arg1[%c0, %c0_0] : memref<8x3xf32, #tpu.memory_space<vmem>>, vector<8x3xf32>
    %c0_1 = arith.constant 0 : index
    %c0_2 = arith.constant 0 : index
    %1 = vector.load %arg2[%c0_1, %c0_2] : memref<3x64xf32, #tpu.memory_space<vmem>>, vector<3x64xf32>
    %c0_3 = arith.constant 0 : index
    %c0_4 = arith.constant 0 : index
    %2 = vector.load %arg3[%c0_3, %c0_4] : memref<1x64xf32, #tpu.memory_space<vmem>>, vector<1x64xf32>
    %3 = vector.extract_strided_slice %0 {offsets = [0, 0], sizes = [8, 1], strides = [1, 1]} : vector<8x3xf32> to vector<8x1xf32>
    %4 = vector.extract_strided_slice %1 {offsets = [0, 0], sizes = [1, 64], strides = [1, 1]} : vector<3x64xf32> to vector<1x64xf32>
    %5 = vector.broadcast %3 : vector<8x1xf32> to vector<8x64xf32>
    %6 = vector.broadcast %4 : vector<1x64xf32> to vector<8x64xf32>
    %7 = arith.mulf %5, %6 : vector<8x64xf32>
    %8 = vector.broadcast %2 : vector<1x64xf32> to vector<8x64xf32>
    %9 = arith.addf %8, %7 : vector<8x64xf32>
    %10 = vector.extract_strided_slice %0 {offsets = [0, 1], sizes = [8, 1], strides = [1, 1]} : vector<8x3xf32> to vector<8x1xf32>
    %11 = vector.extract_strided_slice %1 {offsets = [1, 0], sizes = [1, 64], strides = [1, 1]} : vector<3x64xf32> to vector<1x64xf32>
    %12 = vector.broadcast %10 : vector<8x1xf32> to vector<8x64xf32>
    %13 = vector.broadcast %11 : vector<1x64xf32> to vector<8x64xf32>
    %14 = arith.mulf %12, %13 : vector<8x64xf32>
    %15 = arith.addf %9, %14 : vector<8x64xf32>
    %16 = vector.extract_strided_slice %0 {offsets = [0, 2], sizes = [8, 1], strides = [1, 1]} : vector<8x3xf32> to vector<8x1xf32>
    %17 = vector.extract_strided_slice %1 {offsets = [2, 0], sizes = [1, 64], strides = [1, 1]} : vector<3x64xf32> to vector<1x64xf32>
    %18 = vector.broadcast %16 : vector<8x1xf32> to vector<8x64xf32>
    %19 = vector.broadcast %17 : vector<1x64xf32> to vector<8x64xf32>
    %20 = arith.mulf %18, %19 : vector<8x64xf32>
    %21 = arith.addf %15, %20 : vector<8x64xf32>
    %cst = arith.constant 0.000000e+00 : f32
    %22 = vector.broadcast %cst : f32 to vector<8x64xf32>
    %23 = arith.maximumf %21, %22 : vector<8x64xf32>
    %c0_5 = arith.constant 0 : index
    %c0_6 = arith.constant 0 : index
    %24 = vector.load %arg4[%c0_5, %c0_6] : memref<64x784xf32, #tpu.memory_space<vmem>>, vector<64x784xf32>
    %cst_7 = arith.constant dense<0.000000e+00> : vector<8x784xf32>
    %25 = tpu.matmul %23, %24, %cst_7 {dimension_numbers = #tpu.dot_dimension_numbers<[1], [0], [0], [1], [0, 0, 1, 1], [], []>} : vector<8x64xf32>, vector<64x784xf32>, vector<8x784xf32> -> vector<8x784xf32>
    %c0_8 = arith.constant 0 : index
    %c0_9 = arith.constant 0 : index
    %26 = vector.load %arg5[%c0_8, %c0_9] : memref<1x784xf32, #tpu.memory_space<vmem>>, vector<1x784xf32>
    %27 = vector.broadcast %26 : vector<1x784xf32> to vector<8x784xf32>
    %28 = arith.addf %25, %27 : vector<8x784xf32>
    %c0_10 = arith.constant 0 : index
    %c0_11 = arith.constant 0 : index
    %29 = vector.load %arg6[%c0_10, %c0_11] : memref<8x784xf32, #tpu.memory_space<vmem>>, vector<8x784xf32>
    tpu.vector_store %arg6[%c0_10, %c0_11], %28 {strides = array<i32>} : memref<8x784xf32, #tpu.memory_space<vmem>>, vector<8x784xf32>,
    return
  }
  func.func @transform_0(%arg0: i32) -> (i32, i32) {
    %c0_i32 = arith.constant 0 : i32
    %c0_i32_0 = arith.constant 0 : i32
    return %arg0, %c0_i32 : i32, i32
  }
  func.func @transform_1(%arg0: i32) -> (i32, i32) {
    %c0_i32 = arith.constant 0 : i32
    %c0_i32_0 = arith.constant 0 : i32
    %c0_i32_1 = arith.constant 0 : i32
    return %c0_i32, %c0_i32_0 : i32, i32
  }
  func.func @transform_2(%arg0: i32) -> (i32, i32) {
    %c0_i32 = arith.constant 0 : i32
    %c0_i32_0 = arith.constant 0 : i32
    %c0_i32_1 = arith.constant 0 : i32
    return %c0_i32, %c0_i32_0 : i32, i32
  }
  func.func @transform_3(%arg0: i32) -> (i32, i32) {
    %c0_i32 = arith.constant 0 : i32
    %c0_i32_0 = arith.constant 0 : i32
    %c0_i32_1 = arith.constant 0 : i32
    return %c0_i32, %c0_i32_0 : i32, i32
  }
  func.func @transform_4(%arg0: i32) -> (i32, i32) {
    %c0_i32 = arith.constant 0 : i32
    %c0_i32_0 = arith.constant 0 : i32
    %c0_i32_1 = arith.constant 0 : i32
    return %c0_i32, %c0_i32_0 : i32, i32
  }
  func.func @transform_5(%arg0: i32) -> (i32, i32) {
    %c0_i32 = arith.constant 0 : i32
    %c0_i32_0 = arith.constant 0 : i32
    return %arg0, %c0_i32 : i32, i32
  }
}

</mosaic_0001>

<bundles_post_ra>
// kernel: decoder_forward.1
= control target key start
LH: loop header
LB: loop body
LE: loop exit
PB: predicated region body
PF: predicated region fallthrough
CT: control target
= control target key end

     0   :  { %10 = vsyncpa [#allocation3], 0  ;;  %s433_s0 = inlined_call_operand.vmem [shape: f32[8,3], index: 0, kind: input, shape index: {}]   ;;  %s434_s1 = inlined_call_operand.vmem [shape: f32[3,64], index: 1, kind: input, shape index: {}]   ;;  %s435_s2 = inlined_call_operand.vmem [shape: f32[1,64], index: 2, kind: input, shape index: {}]   ;;  %s436_s3 = inlined_call_operand.hbm [shape: f32[64,784], index: 3, kind: input, shape index: {}]   ;;  %s437_s4 = inlined_call_operand.vmem [shape: f32[1,784], index: 4, kind: input, shape index: {}]   ;;  %s438_s5 = inlined_call_operand.hbm [shape: f32[8,784], index: 5, kind: output, shape index: {}]  }
   0x1   :  { %11 = vsyncpa [#allocation4], 0  ;;  %s22_s20 = sshll.u32 %s436_s3, 4  ;;  %s378_s21 = smov [#allocation2]   ;;  %s23_s20 = int_to_ptr.hbm [resolvable:$true] %s22_s20 }
   0x2   :  { %s24_s22 = sshll.u32 %s378_s21, 4  ;;  %s379_s23 = smov 896   ;;  %s25_s22 = int_to_ptr.vmem [resolvable:$true] %s24_s22 }
   0x3   :  { %s380_s24 = smov 56  }
   0x4   :  { %30 = dma.hbm_to_vmem [thread:$0]  %s23_s20, 7168, %s25_s22, [#allocation3], %s379_s23, %s379_s23, %s380_s24  }
   0x5   :  { %374 = dma.done.wait [#allocation3], 7168  }
   0x6   :  { %375 = vsyncadd [#allocation3], 4294960128  ;;  %v381_v0 = vmov 0   ;;  %v382_v1 = vmov 2   ;;  %v37_v2 = vld [vmem:[%s433_s0] sm:$0xff]  ;;  %v115_v3 = vld [vmem:[#allocation2 + $0x188] sm:$0xff] }
   0x7   :  { %321 = vset.pattern.permute.xlu0 %v381_v0  ;;  %323 = vset.pattern.permute.xlu1 %v382_v1  ;;  %v116_v4 = vld [vmem:[#allocation2 + $0x190] sm:$0xff]  ;;  %v117_v5 = vld [vmem:[#allocation2 + $0x198] sm:$0xff]  ;;  %v110_v8 = vld [vmem:[#allocation2 + $0x160] sm:$0xff]  ;;  %v383_v12 = vmov 1   ;;  %vm138_vm0 = vcmask 523264   ;;  %s297_s7 = sshll.u32 %s438_s5, 4  ;;  %s298_s7 = int_to_ptr.hbm [resolvable:$true] %s297_s7 }
   0x8   :  { %42 = vperm.xlu0 %321, %v37_v2   ;;  %59 = vperm.xlu1 %323, %v37_v2   ;;  %v108_v6 = vld [vmem:[#allocation2 + $0x150] sm:$0xff]  ;;  %v109_v7 = vld [vmem:[#allocation2 + $0x158] sm:$0xff]  ;;  %v102_v10 = vld [vmem:[#allocation2 + $0x120] sm:$0xff]  ;;  %vm288_vm1 = vcmask 130048  }
   0x9   :  { %150 = vmatpush.msra.mxu0 %v115_v3  ;;  %170 = vmatpush.msra.mxu1 %v116_v4  ;;  %v101_v9 = vld [vmem:[#allocation2 + $0x118] sm:$0xff]  ;;  %v103_v11 = vld [vmem:[#allocation2 + $0x128] sm:$0xff]  ;;  %v94_v13 = vld [vmem:[#allocation2 + $0xe0] sm:$0xff] }
   0xa   :  { %190 = vmatpush.msra.mxu2 %v117_v5  ;;  %v95_v14 = vld [vmem:[#allocation2 + $0xe8] sm:$0xff]  ;;  %v96_v15 = vld [vmem:[#allocation2 + $0xf0] sm:$0xff]  ;;  %v118_v16 = vld [vmem:[#allocation2 + $0x1a0] sm:$0xff] }
   0xb   :  { %151 = vmatpush.msra.mxu0 %v108_v6  ;;  %171 = vmatpush.msra.mxu1 %v109_v7  ;;  %v87_v17 = vld [vmem:[#allocation2 + $0xa8] sm:$0xff]  ;;  %v88_v18 = vld [vmem:[#allocation2 + $0xb0] sm:$0xff]  ;;  %v89_v19 = vld [vmem:[#allocation2 + $0xb8] sm:$0xff] }
   0xc   :  { %191 = vmatpush.msra.mxu2 %v110_v8  ;;  %210 = vmatpush.msra.mxu3 %v118_v16  ;;  %v111_v20 = vld [vmem:[#allocation2 + $0x168] sm:$0xff]  ;;  %v80_v21 = vld [vmem:[#allocation2 + $0x70] sm:$0xff]  ;;  %v81_v22 = vld [vmem:[#allocation2 + $0x78] sm:$0xff] }
   0xd   :  { %152 = vmatpush.msra.mxu0 %v101_v9  ;;  %172 = vmatpush.msra.mxu1 %v102_v10  ;;  %v82_v23 = vld [vmem:[#allocation2 + $0x80] sm:$0xff]  ;;  %v104_v24 = vld [vmem:[#allocation2 + $0x130] sm:$0xff]  ;;  %v73_v25 = vld [vmem:[#allocation2 + $0x38] sm:$0xff] }
   0xe   :  { %192 = vmatpush.msra.mxu2 %v103_v11  ;;  %211 = vmatpush.msra.mxu3 %v111_v20  ;;  %v74_v26 = vld [vmem:[#allocation2 + $0x40] sm:$0xff]  ;;  %v75_v27 = vld [vmem:[#allocation2 + $0x48] sm:$0xff]  ;;  %v97_v28 = vld [vmem:[#allocation2 + $0xf8] sm:$0xff] }
   0xf   :  { %153 = vmatpush.msra.mxu0 %v94_v13  ;;  %173 = vmatpush.msra.mxu1 %v95_v14  ;;  %v66_v29 = vld [vmem:[#allocation2] sm:$0xff]  ;;  %v67_v30 = vld [vmem:[#allocation2 + $0x8] sm:$0xff]  ;;  %v68_v31 = vld [vmem:[#allocation2 + $0x10] sm:$0xff] }
  0x10   :  { %322 = vset.pattern.permute.xlu0 %v383_v12  ;;  %193 = vmatpush.msra.mxu2 %v96_v15  ;;  %v90_v32 = vld [vmem:[#allocation2 + $0xc0] sm:$0xff]  ;;  %v119_v33 = vld [vmem:[#allocation2 + $0x1a8] sm:$0xff]  ;;  %v120_v34 = vld [vmem:[#allocation2 + $0x1b0] sm:$0xff] }
  0x11   :  { %52 = vperm.xlu0 %322, %v37_v2   ;;  %154 = vmatpush.msra.mxu0 %v87_v17  ;;  %v121_v35 = vld [vmem:[#allocation2 + $0x1b8] sm:$0xff]  ;;  %v83_v36 = vld [vmem:[#allocation2 + $0x88] sm:$0xff]  ;;  %v112_v37 = vld [vmem:[#allocation2 + $0x170] sm:$0xff] }
  0x12   :  { %174 = vmatpush.msra.mxu1 %v88_v18  ;;  %194 = vmatpush.msra.mxu2 %v89_v19  ;;  %v113_v38 = vld [vmem:[#allocation2 + $0x178] sm:$0xff]  ;;  %v114_v39 = vld [vmem:[#allocation2 + $0x180] sm:$0xff]  ;;  %v76_v40 = vld [vmem:[#allocation2 + $0x50] sm:$0xff] }
  0x13   :  { %155 = vmatpush.msra.mxu0 %v80_v21  ;;  %212 = vmatpush.msra.mxu3 %v104_v24  ;;  %v105_v41 = vld [vmem:[#allocation2 + $0x138] sm:$0xff]  ;;  %v106_v42 = vld [vmem:[#allocation2 + $0x140] sm:$0xff]  ;;  %v107_v43 = vld [vmem:[#allocation2 + $0x148] sm:$0xff] }
  0x14   :  { %175 = vmatpush.msra.mxu1 %v81_v22  ;;  %195 = vmatpush.msra.mxu2 %v82_v23  ;;  %v69_v44 = vld [vmem:[#allocation2 + $0x18] sm:$0xff]  ;;  %v98_v45 = vld [vmem:[#allocation2 + $0x100] sm:$0xff]  ;;  %v99_v46 = vld [vmem:[#allocation2 + $0x108] sm:$0xff] }
  0x15   :  { %156 = vmatpush.msra.mxu0 %v73_v25  ;;  %213 = vmatpush.msra.mxu3 %v97_v28  ;;  %v100_v47 = vld [vmem:[#allocation2 + $0x110] sm:$0xff]  ;;  %v91_v48 = vld [vmem:[#allocation2 + $0xc8] sm:$0xff]  ;;  %v93_v50 = vld [vmem:[#allocation2 + $0xd8] sm:$0xff] }
  0x16   :  { %176 = vmatpush.msra.mxu1 %v74_v26  ;;  %196 = vmatpush.msra.mxu2 %v75_v27  ;;  %v92_v49 = vld [vmem:[#allocation2 + $0xd0] sm:$0xff]  ;;  %v85_v52 = vld [vmem:[#allocation2 + $0x98] sm:$0xff]  ;;  %v86_v53 = vld [vmem:[#allocation2 + $0xa0] sm:$0xff] }
  0x17   :  { %157 = vmatpush.msra.mxu0 %v66_v29  ;;  %214 = vmatpush.msra.mxu3 %v90_v32  ;;  %v84_v51 = vld [vmem:[#allocation2 + $0x90] sm:$0xff]  ;;  %v77_v54 = vld [vmem:[#allocation2 + $0x58] sm:$0xff]  ;;  %v78_v55 = vld [vmem:[#allocation2 + $0x60] sm:$0xff] }
  0x18   :  { %177 = vmatpush.msra.mxu1 %v67_v30  ;;  %197 = vmatpush.msra.mxu2 %v68_v31  ;;  %v79_v56 = vld [vmem:[#allocation2 + $0x68] sm:$0xff]  ;;  %v70_v57 = vld [vmem:[#allocation2 + $0x20] sm:$0xff]  ;;  %v72_v59 = vld [vmem:[#allocation2 + $0x30] sm:$0xff] }
  0x19   :  { %324 = vset.pattern.permute.xlu0 %v382_v1  ;;  %230 = vmatpush.msrb.mxu0 %v119_v33  ;;  %v71_v58 = vld [vmem:[#allocation2 + $0x28] sm:$0xff]  ;;  %v38_v60 = vld [vmem:[%s434_s1] sm:$0x7] }
  0x1a   :  { %250 = vmatpush.msrb.mxu1 %v120_v34  ;;  %270 = vmatpush.msrb.mxu2 %v121_v35  ;;  %v45_v62 = vperm.slane %v38_v60, 0  ;;  %v325_v63 = vld [vmem:[%s435_s2] ss:$0 sm:$0xff]  ;;  %v55_v1 = vperm.slane %v38_v60, 1  ;;  %v62_v2 = vperm.slane %v38_v60, 2 }
  0x1b   :  { %215 = vmatpush.msra.mxu3 %v83_v36  ;;  %231 = vmatpush.msrb.mxu0 %v112_v37  ;;  %v122_v11 = vld [vmem:[%s437_s4] sm:$0x7f]  ;;  %s384_s4 = smov [#allocation5]  }
  0x1c   :  { %251 = vmatpush.msrb.mxu1 %v113_v38  ;;  %271 = vmatpush.msrb.mxu2 %v114_v39  ;;  %v124_v12 = vperm.slane %v122_v11, 0  ;;  %v125_v13 = vperm.slane %v122_v11, 1  ;;  %v126_v18 = vperm.slane %v122_v11, 2  ;;  %v127_v19 = vperm.slane %v122_v11, 3  ;;  %s295_s29 = sshll.u32 %s384_s4, 4  ;;  %s296_s29 = int_to_ptr.vmem [resolvable:$true] %s295_s29 }
  0x1d   :  { %216 = vmatpush.msra.mxu3 %v76_v40  ;;  %232 = vmatpush.msrb.mxu0 %v105_v41  ;;  %v128_v20 = vperm.slane %v122_v11, 4  ;;  %v129_v21 = vperm.slane %v122_v11, 5  ;;  %v130_v30 = vperm.slane %v122_v11, 6 }
  0x1e   :  { %252 = vmatpush.msrb.mxu1 %v106_v42  ;;  %272 = vmatpush.msrb.mxu2 %v107_v43 }
  0x1f   :  { %217 = vmatpush.msra.mxu3 %v69_v44  ;;  %233 = vmatpush.msrb.mxu0 %v98_v45 }
  0x20   :  { %253 = vmatpush.msrb.mxu1 %v99_v46  ;;  %273 = vmatpush.msrb.mxu2 %v100_v47 }
  0x21   :  { %234 = vmatpush.msrb.mxu0 %v91_v48 }
  0x22   :  { %254 = vmatpush.msrb.mxu1 %v92_v49  ;;  %274 = vmatpush.msrb.mxu2 %v93_v50 }
  0x23   :  { %235 = vmatpush.msrb.mxu0 %v84_v51 }
  0x24   :  { %255 = vmatpush.msrb.mxu1 %v85_v52  ;;  %275 = vmatpush.msrb.mxu2 %v86_v53 }
  0x25   :  { %236 = vmatpush.msrb.mxu0 %v77_v54 }
  0x26   :  { %256 = vmatpush.msrb.mxu1 %v78_v55  ;;  %276 = vmatpush.msrb.mxu2 %v79_v56 }
  0x27   :  { %237 = vmatpush.msrb.mxu0 %v70_v57 }
  0x28   :  { %257 = vmatpush.msrb.mxu1 %v71_v58  ;;  %277 = vmatpush.msrb.mxu2 %v72_v59 }
  0x7a   :  { %v43_v61 = vpop.permute.xlu0 %42  ;;  %v60_v3 = vpop.permute.xlu1 %59 }
  0x7b   :  { %v46_v0 = vmul.f32 %v45_v62, %v43_v61  ;;  %v63_v7 = vmul.f32 %v62_v2, %v60_v3 }
  0x7d   :  { %v50_v5 = vadd.f32 %v325_v63, %v46_v0 }
  0x83   :  { %v53_v4 = vpop.permute.xlu0 %52 }
  0x84   :  { %v56_v6 = vmul.f32 %v55_v1, %v53_v4 }
  0x86   :  { %v57_v8 = vadd.f32 %v56_v6, %v50_v5 }
  0x88   :  { %v64_v9 = vadd.f32 %v63_v7, %v57_v8 }
  0x8a   :  { %v65_v10 = vmax.f32 %v64_v9, 0.0 }
  0x8c   :  { %307 = vmatmul.msk.f32.vlgmr.msra.gmra.mxu0 %vm138_vm0, %v65_v10  ;;  %308 = vmatmul.msk.f32.vlgmr.msra.gmra.mxu1 %vm138_vm0, %v65_v10 }
  0x8d   :  { %309 = vmatmul.msk.f32.vlgmr.msra.gmra.mxu2 %vm138_vm0, %v65_v10  ;;  %310 = vmatmul.msk.f32.vlgmr.msra.gmra.mxu3 %vm138_vm0, %v65_v10 }
  0x94   :  { %311 = vmatmul.msk.f32.vlgmr.msrb.gmra.mxu0 %vm138_vm0, %v65_v10  ;;  %312 = vmatmul.msk.f32.vlgmr.msrb.gmra.mxu1 %vm138_vm0, %v65_v10 }
  0x95   :  { %313 = vmatmul.msk.f32.vlgmr.msrb.gmra.mxu2 %vm138_vm0, %v65_v10 }
 0x109   :  { %v159_v14 = vpop.f32.mrf.mxu0  ;;  %v179_v15 = vpop.f32.mrf.mxu1 }
 0x10a   :  { %v160_v16 = vadd.f32 %v159_v14, %v124_v12  ;;  %v180_v17 = vadd.f32 %v179_v15, %v125_v13 }
 0x10c   :  { %282 = vst [vmem:[#allocation5] sm:$0xff] %v160_v16 }
 0x10d   :  { %283 = vst [vmem:[#allocation5 + $0x8] sm:$0xff] %v180_v17 }
 0x110   :  { %v199_v22 = vpop.f32.mrf.mxu2  ;;  %v219_v23 = vpop.f32.mrf.mxu3 }
 0x111   :  { %v200_v24 = vadd.f32 %v199_v22, %v126_v18  ;;  %v220_v25 = vadd.f32 %v219_v23, %v127_v19  ;;  %v239_v26 = vpop.f32.mrf.mxu0  ;;  %v259_v27 = vpop.f32.mrf.mxu1 }
 0x112   :  { %v240_v28 = vadd.f32 %v239_v26, %v128_v20  ;;  %v260_v29 = vadd.f32 %v259_v27, %v129_v21 }
 0x113   :  { %284 = vst [vmem:[#allocation5 + $0x10] sm:$0xff] %v200_v24 }
 0x114   :  { %285 = vst [vmem:[#allocation5 + $0x18] sm:$0xff] %v220_v25 }
 0x115   :  { %286 = vst [vmem:[#allocation5 + $0x20] sm:$0xff] %v240_v28 }
 0x116   :  { %287 = vst [vmem:[#allocation5 + $0x28] sm:$0xff] %v260_v29 }
 0x118   :  { %v279_v31 = vpop.f32.mrf.mxu2 }
 0x119   :  { %v280_v32 = vadd.f32 %v279_v31, %v130_v30 }
 0x11b   :  { %289 = vst.msk [vmem:[#allocation5 + $0x30] sm:$0xff] %vm288_vm1, %v280_v32 }
 0x11c   :  { %300 = dma.vmem_to_hbm [thread:$0]  %s296_s29, 896, %s298_s7, [#allocation4]  }
 0x11d   :  { %376 = dma.done.wait [#allocation4], 896  }
 0x11e   :  { %377 = vsyncadd [#allocation4], 4294966400 }
 0x11f   :  { %305 = vsyncpa [#allocation3], 1 }
 0x120   :  { %306 = vsyncpa [#allocation4], 1 }

</bundles_post_ra>
